<compile_context>
chip_gen: v7x
topology: tpu7x:2x2x1
jax: 0.10.0
libtpu: 0.0.40
codegen_flags: <defaults>
</compile_context>

<pallas_src>
import functools
import math

import jax
import jax.numpy as jnp
from jax.experimental import pallas as pl
from jax.experimental.pallas import tpu as pltpu


def _batch_glu_kernel(x_ref, w_in_ref, b_in_ref, w_out_ref, b_out_ref, o_ref,
                      *, activation, d_mid, compute_dtype):
    x = x_ref[0].astype(compute_dtype)                          # (bb, d_in)

    # Fused input projection: one (bb, d_in) @ (d_in, 2*d_mid) MXU matmul.
    mid = jnp.dot(x, w_in_ref[0].astype(compute_dtype),
                  preferred_element_type=jnp.float32) + b_in_ref[0]   # (bb, 2*d_mid)

    # GLU: activation on the first half, gated by the (unactivated) second
    # half. d_mid is a static multiple of 128 -> lane-aligned slice, no relayout.
    gated = (activation(mid[:, :d_mid]) * mid[:, d_mid:]).astype(compute_dtype)

    out = jnp.dot(gated, w_out_ref[0].astype(compute_dtype),
                  preferred_element_type=jnp.float32) + b_out_ref[0]
    o_ref[0] = out.astype(o_ref.dtype)                          # (bb, d_out)


def batch_glu(x, params, *, activation=jax.nn.gelu, block_b=256,
              compute_dtype=jnp.float32):
    """x: (B, n_streams, d_in) -> (B, n_streams, d_out)."""
    B, N, d_in = x.shape
    d_mid = params["w_in"].shape[-1] // 2
    d_out = params["w_out"].shape[-1]

    # Streams-major layout: each grid step matmuls a full (bb, d_in) batch slab
    # against one stream's weights (contiguous per-stream activation reads).
    x_t = jnp.transpose(x, (1, 0, 2))                           # (N, B, d_in)

    # Batch block size: fill the MXU M dimension; pad B so stores are unmasked.
    bb = min(block_b, B)
    pad = (-B) % bb
    if pad:
        x_t = jnp.pad(x_t, ((0, 0), (0, pad), (0, 0)))
    B_pad = B + pad
    n_bblocks = B_pad // bb

    flops = 2 * B * N * (d_in * 2 * d_mid + d_mid * d_out)
    bytes_accessed = 4 * (
        x.size
        + params["w_in"].size + params["b_in"].size
        + params["w_out"].size + params["b_out"].size
        + B * N * d_out)

    kernel = functools.partial(_batch_glu_kernel,
                               activation=activation,
                               d_mid=d_mid,
                               compute_dtype=compute_dtype)

    per_stream = lambda shape: pl.BlockSpec(shape, lambda n, i: (n, 0, 0))

    out_t = pl.pallas_call(
        kernel,
        grid=(N, n_bblocks),                                    # stream outer, batch inner
        in_specs=[
            pl.BlockSpec((1, bb, d_in), lambda n, i: (n, i, 0)),   # x
            per_stream((1, d_in, 2 * d_mid)),                      # w_in
            per_stream((1, 1, 2 * d_mid)),                         # b_in
            per_stream((1, d_mid, d_out)),                         # w_out
            per_stream((1, 1, d_out)),                             # b_out
        ],
        out_specs=pl.BlockSpec((1, bb, d_out), lambda n, i: (n, i, 0)),
        out_shape=jax.ShapeDtypeStruct((N, B_pad, d_out), x.dtype),
        compiler_params=pltpu.CompilerParams(
            dimension_semantics=("parallel", "arbitrary")),
        cost_estimate=pl.CostEstimate(
            flops=flops,
            transcendentals=B * N * d_mid,
            bytes_accessed=bytes_accessed),
    )(x_t,
      params["w_in"], params["b_in"],
      params["w_out"], params["b_out"])

    if pad:
        out_t = out_t[:, :B, :]
    return jnp.transpose(out_t, (1, 0, 2))                      # (B, N, d_out)


def batch_glu_reference(x, params, activation=jax.nn.gelu):
    """Pure-JAX reference matching the PyTorch BatchGLU forward."""
    d_mid = params["w_in"].shape[-1] // 2
    y = jnp.einsum("bnd,ndm->bnm", x, params["w_in"]) + params["b_in"][:, 0, :]
    mid = activation(y[..., :d_mid]) * y[..., d_mid:]
    return jnp.einsum("bnm,nmo->bno", mid, params["w_out"]) + params["b_out"][:, 0, :]


def init_params(key, n_streams, d_in, d_mid, d_out, dtype=jnp.float32):
    """Mirrors BatchLinear's uniform(-1/sqrt(d_in), 1/sqrt(d_in)) init.

    Weights are stored pre-transposed as (n_streams, in, out); the GLU input
    projection is stored as a single (d_in, 2*d_mid) matrix per stream.
    """
    ks = jax.random.split(key, 4)
    b_in = 1.0 / math.sqrt(d_in)
    b_mid = 1.0 / math.sqrt(d_mid)
    u = lambda k, shape, bound: jax.random.uniform(k, shape, dtype, -bound, bound)
    return dict(
        w_in=u(ks[0], (n_streams, d_in, 2 * d_mid), b_in),
        b_in=u(ks[1], (n_streams, 1, 2 * d_mid), b_in),
        w_out=u(ks[2], (n_streams, d_mid, d_out), b_mid),
        b_out=u(ks[3], (n_streams, 1, d_out), b_mid),
    )


if __name__ == "__main__":
    # Small but TPU-friendly shapes: lane-aligned feature dims (128) and a
    # batch/token axis that fills one full MXU pass per grid step.
    B, N = 128, 4                       # tokens, n_streams
    D_IN, D_MID, D_OUT = 128, 128, 128

    key = jax.random.PRNGKey(0)
    kx, kp = jax.random.split(key)
    x = jax.random.normal(kx, (B, N, D_IN), jnp.float32)
    params = init_params(kp, N, D_IN, D_MID, D_OUT)

    out = batch_glu(x, params)
    out = jax.block_until_ready(out)

    ref = batch_glu_reference(x, params)
    assert out.shape == (B, N, D_OUT)
    assert jnp.allclose(out, ref, atol=1e-4, rtol=1e-4)

    print("KERNEL_OK")
</pallas_src>

<mosaic_0001>
module attributes {stable_mosaic.version = 11 : i64} {
  func.func @_batch_glu_kernel(%arg0: i32, %arg1: i32, %arg2: memref<1x128x128xf32, #tpu.memory_space<vmem>>, %arg3: memref<1x128x256xf32, #tpu.memory_space<vmem>>, %arg4: memref<1x1x256xf32, #tpu.memory_space<vmem>>, %arg5: memref<1x128x128xf32, #tpu.memory_space<vmem>>, %arg6: memref<1x1x128xf32, #tpu.memory_space<vmem>>, %arg7: memref<1x128x128xf32, #tpu.memory_space<vmem>>) attributes {dimension_semantics = [#tpu.dimension_semantics<parallel>, #tpu.dimension_semantics<arbitrary>], iteration_bounds = array<i64: 4, 1>, scalar_prefetch = 0 : i64, scratch_operands = 0 : i64, tpu.core_type = #tpu.core_type<tc>, window_params = [{transform_indices = @transform_0, window_bounds = array<i64: 1, 128, 128>}, {transform_indices = @transform_1, window_bounds = array<i64: 1, 128, 256>}, {transform_indices = @transform_2, window_bounds = array<i64: 1, 1, 256>}, {transform_indices = @transform_3, window_bounds = array<i64: 1, 128, 128>}, {transform_indices = @transform_4, window_bounds = array<i64: 1, 1, 128>}, {transform_indices = @transform_5, window_bounds = array<i64: 1, 128, 128>}]} {
    %c0 = arith.constant 0 : index
    %c0_0 = arith.constant 0 : index
    %c0_1 = arith.constant 0 : index
    %0 = vector.load %arg2[%c0, %c0_0, %c0_1] : memref<1x128x128xf32, #tpu.memory_space<vmem>>, vector<1x128x128xf32>
    %1 = vector.shape_cast %0 : vector<1x128x128xf32> to vector<128x128xf32>
    %c0_2 = arith.constant 0 : index
    %c0_3 = arith.constant 0 : index
    %c0_4 = arith.constant 0 : index
    %2 = vector.load %arg3[%c0_2, %c0_3, %c0_4] : memref<1x128x256xf32, #tpu.memory_space<vmem>>, vector<1x128x256xf32>
    %3 = vector.shape_cast %2 : vector<1x128x256xf32> to vector<128x256xf32>
    %cst = arith.constant dense<0.000000e+00> : vector<128x256xf32>
    %4 = tpu.matmul %1, %3, %cst {dimension_numbers = #tpu.dot_dimension_numbers<[1], [0], [0], [1], [0, 0, 1, 1], [], []>} : vector<128x128xf32>, vector<128x256xf32>, vector<128x256xf32> -> vector<128x256xf32>
    %c0_5 = arith.constant 0 : index
    %c0_6 = arith.constant 0 : index
    %c0_7 = arith.constant 0 : index
    %5 = vector.load %arg4[%c0_5, %c0_6, %c0_7] : memref<1x1x256xf32, #tpu.memory_space<vmem>>, vector<1x1x256xf32>
    %6 = vector.shape_cast %5 : vector<1x1x256xf32> to vector<1x256xf32>
    %7 = vector.broadcast %6 : vector<1x256xf32> to vector<128x256xf32>
    %8 = arith.addf %4, %7 : vector<128x256xf32>
    %9 = vector.extract_strided_slice %8 {offsets = [0, 0], sizes = [128, 128], strides = [1, 1]} : vector<128x256xf32> to vector<128x128xf32>
    %10 = arith.mulf %9, %9 : vector<128x128xf32>
    %11 = arith.mulf %9, %10 : vector<128x128xf32>
    %cst_8 = arith.constant 4.471500e-02 : f32
    %12 = vector.broadcast %cst_8 : f32 to vector<128x128xf32>
    %13 = arith.mulf %12, %11 : vector<128x128xf32>
    %14 = arith.addf %9, %13 : vector<128x128xf32>
    %cst_9 = arith.constant 0.797884583 : f32
    %15 = vector.broadcast %cst_9 : f32 to vector<128x128xf32>
    %16 = arith.mulf %15, %14 : vector<128x128xf32>
    %17 = math.tanh %16 : vector<128x128xf32>
    %cst_10 = arith.constant 1.000000e+00 : f32
    %18 = vector.broadcast %cst_10 : f32 to vector<128x128xf32>
    %19 = arith.addf %18, %17 : vector<128x128xf32>
    %cst_11 = arith.constant 5.000000e-01 : f32
    %20 = vector.broadcast %cst_11 : f32 to vector<128x128xf32>
    %21 = arith.mulf %20, %19 : vector<128x128xf32>
    %22 = arith.mulf %9, %21 : vector<128x128xf32>
    %23 = vector.extract_strided_slice %8 {offsets = [0, 128], sizes = [128, 128], strides = [1, 1]} : vector<128x256xf32> to vector<128x128xf32>
    %24 = arith.mulf %22, %23 : vector<128x128xf32>
    %c0_12 = arith.constant 0 : index
    %c0_13 = arith.constant 0 : index
    %c0_14 = arith.constant 0 : index
    %25 = vector.load %arg5[%c0_12, %c0_13, %c0_14] : memref<1x128x128xf32, #tpu.memory_space<vmem>>, vector<1x128x128xf32>
    %26 = vector.shape_cast %25 : vector<1x128x128xf32> to vector<128x128xf32>
    %cst_15 = arith.constant dense<0.000000e+00> : vector<128x128xf32>
    %27 = tpu.matmul %24, %26, %cst_15 {dimension_numbers = #tpu.dot_dimension_numbers<[1], [0], [0], [1], [0, 0, 1, 1], [], []>} : vector<128x128xf32>, vector<128x128xf32>, vector<128x128xf32> -> vector<128x128xf32>
    %c0_16 = arith.constant 0 : index
    %c0_17 = arith.constant 0 : index
    %c0_18 = arith.constant 0 : index
    %28 = vector.load %arg6[%c0_16, %c0_17, %c0_18] : memref<1x1x128xf32, #tpu.memory_space<vmem>>, vector<1x1x128xf32>
    %29 = vector.shape_cast %28 : vector<1x1x128xf32> to vector<1x128xf32>
    %30 = vector.broadcast %29 : vector<1x128xf32> to vector<128x128xf32>
    %31 = arith.addf %27, %30 : vector<128x128xf32>
    %c0_19 = arith.constant 0 : index
    %c0_20 = arith.constant 0 : index
    %c0_21 = arith.constant 0 : index
    %32 = vector.load %arg7[%c0_19, %c0_20, %c0_21] : memref<1x128x128xf32, #tpu.memory_space<vmem>>, vector<1x128x128xf32>
    %33 = vector.shape_cast %32 : vector<1x128x128xf32> to vector<128x128xf32>
    %34 = vector.shape_cast %31 : vector<128x128xf32> to vector<1x128x128xf32>
    tpu.vector_store %arg7[%c0_19, %c0_20, %c0_21], %34 {strides = array<i32>} : memref<1x128x128xf32, #tpu.memory_space<vmem>>, vector<1x128x128xf32>,
    return
  }
  func.func @transform_0(%arg0: i32, %arg1: i32) -> (i32, i32, i32) {
    %c0_i32 = arith.constant 0 : i32
    %c0_i32_0 = arith.constant 0 : i32
    return %arg0, %arg1, %c0_i32 : i32, i32, i32
  }
  func.func @transform_1(%arg0: i32, %arg1: i32) -> (i32, i32, i32) {
    %c0_i32 = arith.constant 0 : i32
    %c0_i32_0 = arith.constant 0 : i32
    %c0_i32_1 = arith.constant 0 : i32
    return %arg0, %c0_i32, %c0_i32_0 : i32, i32, i32
  }
  func.func @transform_2(%arg0: i32, %arg1: i32) -> (i32, i32, i32) {
    %c0_i32 = arith.constant 0 : i32
    %c0_i32_0 = arith.constant 0 : i32
    %c0_i32_1 = arith.constant 0 : i32
    return %arg0, %c0_i32, %c0_i32_0 : i32, i32, i32
  }
  func.func @transform_3(%arg0: i32, %arg1: i32) -> (i32, i32, i32) {
    %c0_i32 = arith.constant 0 : i32
    %c0_i32_0 = arith.constant 0 : i32
    %c0_i32_1 = arith.constant 0 : i32
    return %arg0, %c0_i32, %c0_i32_0 : i32, i32, i32
  }
  func.func @transform_4(%arg0: i32, %arg1: i32) -> (i32, i32, i32) {
    %c0_i32 = arith.constant 0 : i32
    %c0_i32_0 = arith.constant 0 : i32
    %c0_i32_1 = arith.constant 0 : i32
    return %arg0, %c0_i32, %c0_i32_0 : i32, i32, i32
  }
  func.func @transform_5(%arg0: i32, %arg1: i32) -> (i32, i32, i32) {
    %c0_i32 = arith.constant 0 : i32
    %c0_i32_0 = arith.constant 0 : i32
    return %arg0, %arg1, %c0_i32 : i32, i32, i32
  }
}

</mosaic_0001>

<bundles_post_ra>
// kernel: tpu_custom_call.1
= control target key start
LH: loop header
LB: loop body
LE: loop exit
PB: predicated region body
PF: predicated region fallthrough
CT: control target
= control target key end

     0   :  { %s2286_s0 = inlined_call_operand.hbm [shape: f32[4,128,128], index: 0, kind: input, shape index: {}]   ;;  %s2287_s1 = inlined_call_operand.hbm [shape: f32[4,128,256], index: 1, kind: input, shape index: {}]   ;;  %s2288_s2 = inlined_call_operand.hbm [shape: f32[4,1,256], index: 2, kind: input, shape index: {}]   ;;  %s2289_s3 = inlined_call_operand.hbm [shape: f32[4,128,128], index: 3, kind: input, shape index: {}]   ;;  %s2290_s4 = inlined_call_operand.vmem [shape: f32[4,1,128], index: 4, kind: input, shape index: {}]   ;;  %s2291_s5 = inlined_call_operand.hbm [shape: f32[4,128,128], index: 5, kind: output, shape index: {}]  }
   0x1   :  { %2301 = sst [smem:[#allocation18_spill]] %s2286_s0 }
   0x2   :  { %2302 = sst [smem:[#allocation19_spill]] %s2287_s1 }
   0x3   :  { %10 = vsyncpa [#allocation3], 0 }
   0x4   :  { %12 = vsyncpa [#allocation3 + $0x1], 0 }
   0x5   :  { %13 = vsyncpa [#allocation6], 0 }
   0x6   :  { %15 = vsyncpa [#allocation6 + $0x1], 0 }
   0x7   :  { %16 = vsyncpa [#allocation9], 0 }
   0x8   :  { %18 = vsyncpa [#allocation9 + $0x1], 0 }
   0x9   :  { %19 = vsyncpa [#allocation4], 0 }
   0xa   :  { %21 = vsyncpa [#allocation4 + $0x1], 0  ;;  %s1690_s18 = smov 0   ;;  %s1692_s19 = smov 0  }
   0xb   :  { %s1694_s20 = smov 0   ;;  %s1696_s21 = smov 0  }
   0xc   :  { %s1698_s22 = smov 0   ;;  %s1700_s23 = smov 0  }
   0xd LB: > { %2303 = sst [smem:[#allocation15_spill]] %s1634_s20  ;;  %s1721_s24 = sadd.s32 4294967295, %s1646_s23   ;;  %s1646_s23 = sphi %s1700_s23, %s27_s23   ;;  %s1642_s22 = sphi %s1698_s22, %s2329_s22   ;;  %s1638_s21 = sphi %s1696_s21, %s2328_s21   ;;  %s1634_s20 = sphi %s1694_s20, %s2324_s20   ;;  %s1630_s19 = sphi %s1692_s19, %s2327_s19   ;;  %s1626_s18 = sphi %s1690_s18, %s2326_s18  }
   0xe   : > { %s1136_s25 = sadd.s32 4294967294, %s1646_s23   ;;  %s39_s26 = sadd.s32 1, %s1642_s22 }
   0xf   : > { %s48_s27 = sadd.s32 1, %s1634_s20  ;;  %p41_p0 = scmp.ge.s32.totalorder %s39_s26, 4 }
  0x10   : > { %p55_p1 = scmp.ne.s32.totalorder %s1634_s20, %s1630_s19  ;;  %p56_p2 = scmp.eq.s32.totalorder %s1646_s23, 0 }
  0x11   : > { %p61_p3 = scmp.ne.s32.totalorder %s1630_s19, %s1626_s18  ;;  %s2331_s26 = smov (%p41_p0, %s39_s26), 0 }
  0x12   : > { %2304 = sst [smem:[#allocation16_spill]] %s2331_s26  ;;  %p1733_p4 = por %p56_p2, %p55_p1 }
  0x13   : > { %p62_p5 = scmp.eq.s32.totalorder %s1721_s24, 0  ;;  %s43_s29 = ssub.s32 %s1642_s22, %s2331_s26 }
  0x14   : > { %p191_p6 = scmp.eq.s32.totalorder %s1721_s24, 3  ;;  %p46_p7 = scmp.eq.s32.totalorder %s43_s29, 0 }
  0x15   : > { %p1741_p8 = por %p62_p5, %p61_p3  ;;  %p197_p10 = scmp.eq.s32.totalorder %s1136_s25, 3 }
  0x16   : > { %p1745_p9 = por %p191_p6, %p55_p1  ;;  %p1347_p12 = scmp.lt.s32.totalorder %s1646_s23, 4 }
  0x17   : > { %s2306_s30 = scalar_select %p1741_p8, 1, 0 }
  0x18   : > { %s2307_s6 = scalar_select %p1745_p9, 1, 0 }
  0x19   : > { %s1750_s7 = scalar_select %p46_p7, %s1634_s20, %s48_s27  }
  0x1a   : > { %p1752_p11 = por %p197_p10, %p61_p3  ;;  %s1758_s9 = sand.u32 1, %s1634_s20  }
  0x1b   : > { %2308 = sst [smem:[#allocation17_spill]] %s1750_s7  ;;  %s240_s10 = sand.u32 1, %s1646_s23  }
  0x1c   : > { %s2309_s8 = scalar_select %p1752_p11, 1, 0 }
  0x1d   : > { %s1142_s11 = sshll.u32 %s1758_s9, 8  ;;  %p1764_p13 = pnand %p1347_p12, %p1733_p4 }
  0x1e   : > { %s1164_s13 = sshll.u32 %s1642_s22, 12  ;;  %s2311_s1 = sld [smem:[#allocation19_spill]] }
  0x1f   : > { %s2310_s12 = scalar_select %p1764_p13, 1, 0 }
  0x20   : > { %s244_s17 = scalar_lea.vmem [#allocation5], %s1142_s11  ;;  %s1776_s27 = scalar_lea.sflag [#allocation6], %s240_s10 }
  0x21   : > { %s251_s25 = sshll.u32 %s244_s17, 4  ;;  %p1782_p1 = pneg %p1764_p13  ;;  %s1774_s25 = int_to_ptr.vmem [resolvable:$true] %s251_s25 }
  0x24   : > { %s1772_s16 = scalar_lea.hbm %s2311_s1, %s1164_s13  ;;  %s1441_s11 = scalar_lea.hbm %s2311_s1, 16384 }
  0x25   : > { %s1436_s28 = scalar_lea.hbm %s1772_s16, 4096  ;;  %p1442_p4 = scmp.lt.u32.totalorder %s1772_s16, %s2311_s1 }
  0x26   : > { %p1437_p0 = scmp.ne.s32.totalorder %s1772_s16, %s1436_s28  ;;  %p1443_p5 = scmp.lt.u32.totalorder %s1441_s11, %s1436_s28 }
  0x27   : > { %p1445_p7 = scmp.lt.u32.totalorder %s1436_s28, %s1772_s16 }
  0x28   : > { %p1439_p2 = pnand %p1782_p1, %p1437_p0  ;;  %p1444_p6 = por %p1443_p5, %p1442_p4 }
  0x2a   : > { %p1440_p3 = pneg %p1439_p2  ;;  %p1446_p10 = por %p1445_p7, %p1444_p6 }
  0x2c   : > { %p1447_p12 = pnand %p1446_p10, %p1440_p3 }
  0x2e   : > { %1450 = shalt.err (!%p1447_p12)
}
  0x2f   : > { %s1451_s10 = scalar_lea.vmem %s1774_s25, 4096  ;;  %s1648_s13 = smov [#allocation5]  }
  0x30   : > { %p1452_p0 = scmp.ne.s32.totalorder %s1774_s25, %s1451_s10  ;;  %s1456_s14 = sshll.u32 %s1648_s13, 4  ;;  %s1457_s14 = int_to_ptr.vmem [resolvable:$false] %s1456_s14 }
  0x31   : > { %s1458_s15 = scalar_lea.vmem %s1457_s14, 8192  ;;  %p1459_p9 = scmp.lt.s32.totalorder %s1774_s25, %s1457_s14 }
  0x32   : > { %p1454_p2 = pnand %p1452_p0, %p1782_p1  ;;  %p1460_p8 = scmp.lt.s32.totalorder %s1458_s15, %s1451_s10 }
  0x34   : > { %p1455_p11 = pneg %p1454_p2  ;;  %p1461_p4 = por %p1460_p8, %p1459_p9 }
  0x36   : > { %p1462_p5 = pnand %p1461_p4, %p1455_p11 }
  0x38   : > { %1465 = shalt.err (!%p1462_p5)
}
  0x39   : > { %s1649_s28 = smov 256   ;;  %s1650_s11 = smov 16  }
  0x3a   : > { %1336 = dma.hbm_to_vmem [thread:$0]  (!%p1764_p13), %s1772_s16, 4096, %s1774_s25, %s1776_s27, %s1649_s28, %s1649_s28, %s1650_s11  }
  0x3b   : > { %p1151_p3 = scmp.ge.s32.totalorder %s1646_s23, 1  ;;  %p305_p8 = scmp.lt.s32.totalorder %s1646_s23, 5 }
  0x3c   : > { %s2296_s10 = sshll.u32 %s1758_s9, 7  ;;  %s2295_s13 = sshll.u32 %s1642_s22, 11 }
  0x3d   : > { %p1808_p9 = pnand %p1151_p3, %p305_p8  ;;  %s2314_s0 = sld [smem:[#allocation18_spill]] }
  0x3e   : > { %s221_s16 = scalar_lea.vmem [#allocation2], %s2296_s10  ;;  %s218_s28 = scalar_lea.sflag [#allocation3], %s1758_s9 }
  0x3f   : > { %s2313_s17 = scalar_select %p1808_p9, 1, 0 }
  0x40   : > { %s230_s25 = sshll.u32 %s221_s16, 4  ;;  %s1823_s25 = int_to_ptr.vmem [resolvable:$true] %s230_s25 }
  0x43   : > { %s1819_s1 = scalar_lea.hbm %s2314_s0, %s2295_s13  ;;  %s1471_s14 = scalar_lea.hbm %s2314_s0, 8192 }
  0x44   : > { %s1466_s11 = scalar_lea.hbm %s1819_s1, 2048  ;;  %p1472_p10 = scmp.lt.u32.totalorder %s1819_s1, %s2314_s0 }
  0x45   : > { %p1467_p11 = scmp.ne.s32.totalorder %s1819_s1, %s1466_s11  ;;  %p1473_p12 = scmp.lt.u32.totalorder %s1471_s14, %s1466_s11 }
  0x46   : > { %p1475_p2 = scmp.lt.u32.totalorder %s1466_s11, %s1819_s1 }
  0x47   : > { %p1469_p6 = pnand %p1467_p11, %p1782_p1  ;;  %p1474_p0 = por %p1473_p12, %p1472_p10 }
  0x49   : > { %p1470_p7 = pneg %p1469_p6  ;;  %p1476_p4 = por %p1475_p2, %p1474_p0 }
  0x4b   : > { %p1477_p5 = pnand %p1476_p4, %p1470_p7 }
  0x4d   : > { %1480 = shalt.err (!%p1477_p5)
}
  0x4e   : > { %s1481_s16 = scalar_lea.vmem %s1823_s25, 2048  ;;  %s1651_s26 = smov [#allocation2]  }
  0x4f   : > { %p1482_p3 = scmp.ne.s32.totalorder %s1823_s25, %s1481_s16  ;;  %s1486_s7 = sshll.u32 %s1651_s26, 4  ;;  %s1487_s7 = int_to_ptr.vmem [resolvable:$false] %s1486_s7 }
  0x50   : > { %s1488_s13 = scalar_lea.vmem %s1487_s7, 4096  ;;  %p1489_p6 = scmp.lt.s32.totalorder %s1823_s25, %s1487_s7 }
  0x51   : > { %p1484_p8 = pnand %p1482_p3, %p1782_p1  ;;  %p1490_p9 = scmp.lt.s32.totalorder %s1488_s13, %s1481_s16 }
  0x53   : > { %p1485_p11 = pneg %p1484_p8  ;;  %p1491_p10 = por %p1490_p9, %p1489_p6 }
  0x55   : > { %p1492_p12 = pnand %p1491_p10, %p1485_p11 }
  0x57   : > { %1495 = shalt.err (!%p1492_p12)
}
  0x58   : > { %s2298_s11 = smov 128   ;;  %s1653_s14 = smov 8  }
  0x59   : > { %1333 = dma.hbm_to_vmem [thread:$0]  (!%p1764_p13), %s1819_s1, 2048, %s1823_s25, %s218_s28, %s2298_s11, %s2298_s11, %s1653_s14  }
  0x5a   : > { %s1145_s15 = sshll.u32 %s1758_s9, 1  ;;  %s1165_s16 = sshll.u32 %s1642_s22, 5 }
  0x5b   : > { %s1857_s13 = scalar_lea.hbm %s2288_s2, %s1165_s16  ;;  %s265_s10 = scalar_lea.vmem [#allocation7], %s1145_s15 }
  0x5c   : > { %s273_s0 = sshll.u32 %s265_s10, 4  ;;  %s1496_s20 = scalar_lea.hbm %s1857_s13, 32  ;;  %s274_s0 = int_to_ptr.vmem [resolvable:$true] %s273_s0 }
  0x5d   : > { %p1497_p9 = scmp.ne.s32.totalorder %s1857_s13, %s1496_s20  ;;  %s1501_s28 = scalar_lea.hbm %s2288_s2, 128 }
  0x5e   : > { %p1502_p2 = scmp.lt.u32.totalorder %s1857_s13, %s2288_s2  ;;  %p1503_p4 = scmp.lt.u32.totalorder %s1501_s28, %s1496_s20 }
  0x5f   : > { %p1499_p7 = pnand %p1497_p9, %p1782_p1  ;;  %p1505_p3 = scmp.lt.u32.totalorder %s1496_s20, %s1857_s13 }
  0x60   : > { %p1504_p5 = por %p1503_p4, %p1502_p2 }
  0x61   : > { %p1500_p0 = pneg %p1499_p7 }
  0x62   : > { %p1506_p8 = por %p1505_p3, %p1504_p5 }
  0x64   : > { %p1507_p11 = pnand %p1506_p8, %p1500_p0 }
  0x66   : > { %1510 = shalt.err (!%p1507_p11)
}
  0x67   : > { %s1511_s10 = scalar_lea.vmem %s274_s0, 32  ;;  %s1654_s15 = smov [#allocation7]  }
  0x68   : > { %p1512_p6 = scmp.ne.s32.totalorder %s274_s0, %s1511_s10  ;;  %s1516_s16 = sshll.u32 %s1654_s15, 4  ;;  %s1517_s16 = int_to_ptr.vmem [resolvable:$false] %s1516_s16 }
  0x69   : > { %s1518_s7 = scalar_lea.vmem %s1517_s16, 64  ;;  %p1519_p9 = scmp.lt.s32.totalorder %s274_s0, %s1517_s16 }
  0x6a   : > { %p1514_p10 = pnand %p1512_p6, %p1782_p1  ;;  %p1520_p7 = scmp.lt.s32.totalorder %s1518_s7, %s1511_s10 }
  0x6c   : > { %p1515_p12 = pneg %p1514_p10  ;;  %p1521_p13 = por %p1520_p7, %p1519_p9 }
  0x6e   : > { %p1522_p2 = pnand %p1521_p13, %p1515_p12 }
  0x70   : > { %1525 = shalt.err (!%p1522_p2)
}
  0x71   : > { %p2315_p4 = scmp.ne.s32.totalorder %s2310_s12, 0  ;;  %s2316_s20 = sshll.u32 %s1642_s22, 11 }
  0x72   : > { %s1882_s25 = scalar_lea.hbm %s2289_s3, %s2316_s20  ;;  %s2317_s28 = sshll.u32 %s1758_s9, 7 }
  0x73   : > { %1339 = dma.hbm_to_vmem [thread:$0]  (!%p2315_p4), %s1857_s13, 32, %s274_s0, %s1776_s27  }
  0x74   : > { %s284_s26 = scalar_lea.vmem [#allocation8], %s2317_s28  ;;  %s281_s15 = scalar_lea.sflag [#allocation9], %s1758_s9 }
  0x75   : > { %s291_s10 = sshll.u32 %s284_s26, 4  ;;  %s1526_s16 = scalar_lea.hbm %s1882_s25, 2048  ;;  %s1886_s10 = int_to_ptr.vmem [resolvable:$true] %s291_s10 }
  0x76   : > { %p1527_p13 = scmp.ne.s32.totalorder %s1882_s25, %s1526_s16  ;;  %s1531_s13 = scalar_lea.hbm %s2289_s3, 8192 }
  0x77   : > { %p1532_p3 = scmp.lt.u32.totalorder %s1882_s25, %s2289_s3  ;;  %p1533_p8 = scmp.lt.u32.totalorder %s1531_s13, %s1526_s16 }
  0x78   : > { %p1529_p0 = pnand %p1527_p13, %p1782_p1  ;;  %p1535_p6 = scmp.lt.u32.totalorder %s1526_s16, %s1882_s25 }
  0x79   : > { %p1534_p11 = por %p1533_p8, %p1532_p3 }
  0x7a   : > { %p1530_p5 = pneg %p1529_p0 }
  0x7b   : > { %p1536_p10 = por %p1535_p6, %p1534_p11 }
  0x7d   : > { %p1537_p12 = pnand %p1536_p10, %p1530_p5 }
  0x7f   : > { %1540 = shalt.err (!%p1537_p12)
}
  0x80   : > { %s1541_s11 = scalar_lea.vmem %s1886_s10, 2048  ;;  %s1655_s1 = smov [#allocation8]  }
  0x81   : > { %p1542_p9 = scmp.ne.s32.totalorder %s1886_s10, %s1541_s11  ;;  %s1546_s28 = sshll.u32 %s1655_s1, 4  ;;  %s1547_s28 = int_to_ptr.vmem [resolvable:$false] %s1546_s28 }
  0x82   : > { %s1548_s26 = scalar_lea.vmem %s1547_s28, 4096  ;;  %p1549_p13 = scmp.lt.s32.totalorder %s1886_s10, %s1547_s28 }
  0x83   : > { %p1544_p7 = pnand %p1542_p9, %p1782_p1  ;;  %p1550_p0 = scmp.lt.s32.totalorder %s1548_s26, %s1541_s11 }
  0x85   : > { %p1545_p2 = pneg %p1544_p7  ;;  %p1551_p3 = por %p1550_p0, %p1549_p13 }
  0x87   : > { %p1552_p8 = pnand %p1551_p3, %p1545_p2 }
  0x89   : > { %1555 = shalt.err (!%p1552_p8)
}
  0x8a   : > { %s2318_s16 = smov 128   ;;  %p2319_p1 = scmp.ne.s32.totalorder %s2313_s17, 0 }
  0x8b   : > { %1342 = dma.hbm_to_vmem [thread:$0]  (!%p2315_p4), %s1882_s25, 2048, %s1886_s10, %s281_s15, %s2318_s16, %s2318_s16, %s1653_s14  }
  0x8c   : > { %309 = sbr.rel (%p2319_p1) target bundleno = 722 (0x2d2), region = 40  ;;  %s1918_s29 = sand.u32 (!%p2319_p1), 1, %s1630_s19  }
  0x8d   : > { %s1921_s0 = sshll.u32 (!%p2319_p1), %s1918_s29, 7  ;;  %s312_s12 = scalar_lea.sflag (!%p2319_p1), [#allocation3], %s1918_s29 }
  0x8e   : > { %s1925_s27 = scalar_lea.vmem (!%p2319_p1), [#allocation2], %s1921_s0  ;;  %p2320_p5 = scmp.ne.s32.totalorder (!%p2319_p1), %s2306_s30, 0 }
  0x93   : > { %1609 = dma.done.wait (%p2320_p5), %s312_s12, 2048  }
  0x94   : > { %1611 = vsyncadd (%p2320_p5), %s312_s12, 4294965248  ;;  %s320_s9 = sand.u32 1, %s1721_s24   ;;  %s1153_s17 = sshll.u32 %s1918_s29, 8 }
  0x95   : > { %s321_s14 = scalar_lea.sflag [#allocation6], %s320_s9  ;;  %s1933_s25 = scalar_lea.vmem [#allocation5], %s1153_s17 }
  0x96   : > { %1613 = dma.done.wait (%p2320_p5), %s321_s14, 4128  }
  0x97   : > { %1615 = vsyncadd (%p2320_p5), %s321_s14, 4294963168  ;;  %s1154_s10 = sshll.u32 %s1918_s29, 1  ;;  %s339_s13 = scalar_lea.sflag [#allocation9], %s1918_s29 }
  0x98   : > { %s1940_s15 = scalar_lea.vmem [#allocation7], %s1154_s10  ;;  %s1944_s7 = scalar_lea.vmem [#allocation8], %s1921_s0 }
  0x99   : > { %1617 = dma.done.wait (%p2320_p5), %s339_s13, 2048  }
  0x9a   : > { %1619 = vsyncadd (%p2320_p5), %s339_s13, 4294965248  ;;  %v1656_v0 = vmov 0.0   ;;  %v409_v1 = vld [vmem:[%s1933_s25 + $0x8] sm:$0xff]  ;;  %v411_v2 = vld [vmem:[%s1933_s25 + $0x18] sm:$0xff]  ;;  %p388_p4 = scmp.lt.s32.totalorder %s1638_s21, 3  ;;  %s2213_s1 = scalar_lea.vmem [#allocation10], %s1921_s0 }
  0x9b   : > { %516 = vmatprep.mubr.f32.mxu0 %v1656_v0  ;;  %v408_v3 = vld [vmem:[%s1933_s25] sm:$0xff]  ;;  %v1256_v4 = vpack.c.bf16 %v411_v2, %v409_v1  ;;  %v410_v5 = vld [vmem:[%s1933_s25 + $0x10] sm:$0xff]  ;;  %v413_v6 = vld [vmem:[%s1933_s25 + $0x28] sm:$0xff]  ;;  %s1167_s28 = sshll.u32 %s1638_s21, 11  ;;  %s973_s26 = sshll.u32 %s2213_s1, 4  ;;  %s2236_s26 = int_to_ptr.vmem [resolvable:$true] %s973_s26 }
  0x9c   : > { %v415_v7 = vld [vmem:[%s1933_s25 + $0x38] sm:$0xff]  ;;  %v1258_v8 = vpack.c.bf16 %v410_v5, %v408_v3  ;;  %v412_v10 = vld [vmem:[%s1933_s25 + $0x20] sm:$0xff]  ;;  %v414_v11 = vld [vmem:[%s1933_s25 + $0x30] sm:$0xff]  ;;  %s389_s24 = scalar_select %p388_p4, %s1638_s21, 3 }
  0x9d   : > { %v1260_v9 = vpack.c.bf16 %v415_v7, %v413_v6  ;;  %v417_v12 = vld [vmem:[%s1933_s25 + $0x48] sm:$0xff]  ;;  %1257 = vmatprep.subr.bf16.mxu0 %v1256_v4  ;;  %v419_v13 = vld [vmem:[%s1933_s25 + $0x58] sm:$0xff]  ;;  %v1262_v14 = vpack.c.bf16 %v414_v11, %v412_v10  ;;  %v416_v16 = vld [vmem:[%s1933_s25 + $0x40] sm:$0xff]  ;;  %s2234_s12 = scalar_lea.hbm %s2291_s5, %s1167_s28  ;;  %s1556_s9 = scalar_lea.vmem %s2236_s26, 2048 }
  0x9e   : > { %1259 = vmatpush1.bf16.msra.mxu0 %v1258_v8  ;;  %v1264_v15 = vpack.c.bf16 %v419_v13, %v417_v12  ;;  %v418_v17 = vld [vmem:[%s1933_s25 + $0x50] sm:$0xff]  ;;  %v421_v18 = vld [vmem:[%s1933_s25 + $0x68] sm:$0xff]  ;;  %v423_v19 = vld [vmem:[%s1933_s25 + $0x78] sm:$0xff]  ;;  %s390_s11 = scalar_lea.vmem %s2290_s4, %s389_s24  ;;  %p1557_p11 = scmp.ne.s32.totalorder %s2236_s26, %s1556_s9 }
  0x9f   : > { %1261 = vmatprep.subr.bf16.mxu0 %v1260_v9  ;;  %v1266_v20 = vpack.c.bf16 %v418_v17, %v416_v16  ;;  %v1268_v21 = vpack.c.bf16 %v423_v19, %v421_v18  ;;  %v420_v22 = vld [vmem:[%s1933_s25 + $0x60] sm:$0xff]  ;;  %v422_v23 = vld [vmem:[%s1933_s25 + $0x70] sm:$0xff]  ;;  %v425_v24 = vld [vmem:[%s1933_s25 + $0x88] sm:$0xff]  ;;  %p2321_p6 = scmp.ne.s32.totalorder %s2307_s6, 0  ;;  %s1657_s21 = smov [#allocation10]  }
  0xa0   : > { %v427_v25 = vld [vmem:[%s1933_s25 + $0x98] sm:$0xff]  ;;  %v1270_v26 = vpack.c.bf16 %v422_v23, %v420_v22  ;;  %v424_v28 = vld [vmem:[%s1933_s25 + $0x80] sm:$0xff]  ;;  %v426_v29 = vld [vmem:[%s1933_s25 + $0x90] sm:$0xff]  ;;  %s1560_s17 = sshll.u32 %s1657_s21, 4  ;;  %s1561_s17 = int_to_ptr.vmem [resolvable:$false] %s1560_s17 }
  0xa1   : > { %v1272_v27 = vpack.c.bf16 %v427_v25, %v425_v24  ;;  %v429_v30 = vld [vmem:[%s1933_s25 + $0xa8] sm:$0xff]  ;;  %v431_v31 = vld [vmem:[%s1933_s25 + $0xb8] sm:$0xff]  ;;  %v1274_v32 = vpack.c.bf16 %v426_v29, %v424_v28  ;;  %v428_v34 = vld [vmem:[%s1933_s25 + $0xa0] sm:$0xff]  ;;  %v442_v25 = vlaneseq  ;;  %p1558_p10 = pnand %p1557_p11, %p2321_p6  ;;  %s1562_s14 = scalar_lea.vmem %s1561_s17, 4096 }
  0xa2   : > { %1263 = vmatpush1.bf16.msra.mxu0 %v1262_v14  ;;  %v1276_v33 = vpack.c.bf16 %v431_v31, %v429_v30  ;;  %v430_v35 = vld [vmem:[%s1933_s25 + $0xb0] sm:$0xff]  ;;  %v433_v36 = vld [vmem:[%s1933_s25 + $0xc8] sm:$0xff]  ;;  %v435_v37 = vld [vmem:[%s1933_s25 + $0xd8] sm:$0xff]  ;;  %p1563_p9 = scmp.lt.s32.totalorder %s2236_s26, %s1561_s17  ;;  %p1564_p7 = scmp.lt.s32.totalorder %s1562_s14, %s1556_s9 }
  0xa3   : > { %1265 = vmatprep.subr.bf16.mxu0 %v1264_v15  ;;  %v1278_v38 = vpack.c.bf16 %v430_v35, %v428_v34  ;;  %v1280_v39 = vpack.c.bf16 %v435_v37, %v433_v36  ;;  %v432_v40 = vld [vmem:[%s1933_s25 + $0xc0] sm:$0xff]  ;;  %v434_v41 = vld [vmem:[%s1933_s25 + $0xd0] sm:$0xff]  ;;  %v437_v42 = vld [vmem:[%s1933_s25 + $0xe8] sm:$0xff]  ;;  %p1559_p12 = pneg %p1558_p10 }
  0xa4   : > { %v439_v43 = vld [vmem:[%s1933_s25 + $0xf8] sm:$0xff]  ;;  %v1282_v44 = vpack.c.bf16 %v434_v41, %v432_v40  ;;  %v436_v46 = vld [vmem:[%s1933_s25 + $0xe0] sm:$0xff]  ;;  %v438_v47 = vld [vmem:[%s1933_s25 + $0xf0] sm:$0xff]  ;;  %p1565_p2 = por %p1564_p7, %p1563_p9 }
  0xa5   : > { %v1284_v45 = vpack.c.bf16 %v439_v43, %v437_v42  ;;  %v1286_v48 = vpack.c.bf16 %v438_v47, %v436_v46  ;;  %v392_v49 = vld [vmem:[%s1925_s27] sm:$0xff]  ;;  %v393_v50 = vld [vmem:[%s1925_s27 + $0x8] sm:$0xff]  ;;  %v394_v51 = vld [vmem:[%s1925_s27 + $0x10] sm:$0xff] }
  0xa6   : > { %1267 = vmatpush1.bf16.msra.mxu0 %v1266_v20  ;;  %v395_v52 = vld [vmem:[%s1925_s27 + $0x18] sm:$0xff]  ;;  %v396_v53 = vld [vmem:[%s1925_s27 + $0x20] sm:$0xff]  ;;  %v397_v54 = vld [vmem:[%s1925_s27 + $0x28] sm:$0xff]  ;;  %p1566_p13 = pnand %p1565_p2, %p1559_p12 }
  0xa7   : > { %1269 = vmatprep.subr.bf16.mxu0 %v1268_v21  ;;  %v398_v55 = vld [vmem:[%s1925_s27 + $0x30] sm:$0xff]  ;;  %v399_v56 = vld [vmem:[%s1925_s27 + $0x38] sm:$0xff]  ;;  %v400_v57 = vld [vmem:[%s1925_s27 + $0x40] sm:$0xff] }
  0xa8   : > { %v401_v58 = vld [vmem:[%s1925_s27 + $0x48] sm:$0xff]  ;;  %v402_v59 = vld [vmem:[%s1925_s27 + $0x50] sm:$0xff]  ;;  %v403_v60 = vld [vmem:[%s1925_s27 + $0x58] sm:$0xff] }
  0xa9   : > { %v404_v61 = vld [vmem:[%s1925_s27 + $0x60] sm:$0xff]  ;;  %v405_v62 = vld [vmem:[%s1925_s27 + $0x68] sm:$0xff]  ;;  %v406_v63 = vld [vmem:[%s1925_s27 + $0x70] sm:$0xff] }
  0xaa   : > { %1271 = vmatpush1.bf16.msra.mxu0 %v1270_v26  ;;  %v407_v1 = vld [vmem:[%s1925_s27 + $0x78] sm:$0xff]  ;;  %v773_v2 = vld [vmem:[%s1944_s7] sm:$0xff]  ;;  %v774_v3 = vld [vmem:[%s1944_s7 + $0x8] sm:$0xff]  ;;  %v443_v26 = vshrl.u32 %v442_v25, 7  ;;  %s958_s27 = scalar_lea.sflag [#allocation4], %s1918_s29 }
  0xab   : > { %1273 = vmatprep.subr.bf16.mxu0 %v1272_v27  ;;  %v1288_v4 = vpack.c.bf16 %v774_v3, %v773_v2  ;;  %v775_v5 = vld [vmem:[%s1944_s7 + $0x10] sm:$0xff]  ;;  %v776_v6 = vld [vmem:[%s1944_s7 + $0x18] sm:$0xff]  ;;  %v777_v8 = vld [vmem:[%s1944_s7 + $0x20] sm:$0xff] }
  0xac   : > { %v1292_v7 = vpack.c.bf16 %v776_v6, %v775_v5  ;;  %v779_v10 = vld [vmem:[%s1944_s7 + $0x30] sm:$0xff]  ;;  %v780_v11 = vld [vmem:[%s1944_s7 + $0x38] sm:$0xff]  ;;  %v781_v13 = vld [vmem:[%s1944_s7 + $0x40] sm:$0xff]  ;;  %v444_v27 = vsub.s32 0, %v443_v26 }
  0xad   : > { %1289 = vmatprep.subr.bf16.mxu1 %v1288_v4  ;;  %v1300_v12 = vpack.c.bf16 %v780_v11, %v779_v10  ;;  %v782_v14 = vld [vmem:[%s1944_s7 + $0x48] sm:$0xff]  ;;  %v783_v16 = vld [vmem:[%s1944_s7 + $0x50] sm:$0xff]  ;;  %v784_v17 = vld [vmem:[%s1944_s7 + $0x58] sm:$0xff] }
  0xae   : > { %1275 = vmatpush1.bf16.msra.mxu0 %v1274_v32  ;;  %1291 = vmatpush3.bf16.msra.mxu1 %v1288_v4  ;;  %v1304_v15 = vpack.c.bf16 %v782_v14, %v781_v13  ;;  %v1308_v18 = vpack.c.bf16 %v784_v17, %v783_v16  ;;  %v785_v19 = vld [vmem:[%s1944_s7 + $0x60] sm:$0xff]  ;;  %v786_v20 = vld [vmem:[%s1944_s7 + $0x68] sm:$0xff]  ;;  %v787_v22 = vld [vmem:[%s1944_s7 + $0x70] sm:$0xff] }
  0xaf   : > { %1277 = vmatprep.subr.bf16.mxu0 %v1276_v33  ;;  %1293 = vmatprep.subr.bf16.mxu1 %v1292_v7  ;;  %v1312_v21 = vpack.c.bf16 %v786_v20, %v785_v19  ;;  %v788_v23 = vld [vmem:[%s1944_s7 + $0x78] sm:$0xff] }
  0xb0   : > { %v1316_v24 = vpack.c.bf16 %v788_v23, %v787_v22  ;;  %v440_v28 = vld [vmem:[%s1940_s15] sm:$0x3] }
  0xb1   : > { %v2031_v29 = vrot.slane %v440_v28, %v444_v27 }
  0xb2   : > { %1279 = vmatpush1.bf16.msra.mxu0 %v1278_v38  ;;  %1295 = vmatpush3.bf16.msra.mxu1 %v1292_v7 }
  0xb3   : > { %1281 = vmatprep.subr.bf16.mxu0 %v1280_v39 }
  0xb6   : > { %1283 = vmatpush1.bf16.msra.mxu0 %v1282_v44 }
  0xb7   : > { %1285 = vmatprep.subr.bf16.mxu0 %v1284_v45 }
  0xba   : > { %1287 = vmatpush1.bf16.msra.mxu0 %v1286_v48 }
  0xbd   : > { %517 = vmatmul.mubr.f32.vlgmr.msra.gmra.mrb[0].mxu0 %v392_v49 }
  0xbe   : > { %522 = vmatprep.mubr.f32.mxu0 %v1656_v0 }
  0xc1   : > { %523 = vmatmul.mubr.f32.gmra.mrb[2].mxu0 %v393_v50 }
  0xc2   : > { %528 = vmatprep.mubr.f32.mxu0 %v1656_v0 }
  0xc5   : > { %529 = vmatmul.mubr.f32.gmra.mrb[4].mxu0 %v394_v51 }
  0xc6   : > { %534 = vmatprep.mubr.f32.mxu0 %v1656_v0 }
  0xc9   : > { %535 = vmatmul.mubr.f32.gmra.mrb[6].mxu0 %v395_v52 }
  0xca   : > { %540 = vmatprep.mubr.f32.mxu0 %v1656_v0 }
  0xcd   : > { %541 = vmatmul.mubr.f32.gmra.mrb[8].mxu0 %v396_v53 }
  0xce   : > { %546 = vmatprep.mubr.f32.mxu0 %v1656_v0 }
  0xd1   : > { %547 = vmatmul.mubr.f32.gmra.mrb[10].mxu0 %v397_v54 }
  0xd2   : > { %552 = vmatprep.mubr.f32.mxu0 %v1656_v0 }
  0xd5   : > { %553 = vmatmul.mubr.f32.gmra.mrb[12].mxu0 %v398_v55 }
  0xd6   : > { %558 = vmatprep.mubr.f32.mxu0 %v1656_v0 }
  0xd9   : > { %559 = vmatmul.mubr.f32.gmra.mrb[14].mxu0 %v399_v56 }
  0xda   : > { %564 = vmatprep.mubr.f32.mxu0 %v1656_v0 }
  0xdd   : > { %565 = vmatmul.mubr.f32.gmra.mrb[16].mxu0 %v400_v57 }
  0xde   : > { %570 = vmatprep.mubr.f32.mxu0 %v1656_v0 }
  0xe1   : > { %571 = vmatmul.mubr.f32.gmra.mrb[18].mxu0 %v401_v58 }
  0xe2   : > { %576 = vmatprep.mubr.f32.mxu0 %v1656_v0 }
  0xe5   : > { %577 = vmatmul.mubr.f32.gmra.mrb[20].mxu0 %v402_v59 }
  0xe6   : > { %582 = vmatprep.mubr.f32.mxu0 %v1656_v0 }
  0xe9   : > { %583 = vmatmul.mubr.f32.gmra.mrb[22].mxu0 %v403_v60 }
  0xea   : > { %588 = vmatprep.mubr.f32.mxu0 %v1656_v0 }
  0xed   : > { %589 = vmatmul.mubr.f32.gmra.mrb[24].mxu0 %v404_v61 }
  0xee   : > { %594 = vmatprep.mubr.f32.mxu0 %v1656_v0 }
  0xf1   : > { %595 = vmatmul.mubr.f32.gmra.mrb[26].mxu0 %v405_v62 }
  0xf2   : > { %600 = vmatprep.mubr.f32.mxu0 %v1656_v0 }
  0xf5   : > { %601 = vmatmul.mubr.f32.gmra.mrb[28].mxu0 %v406_v63 }
  0xf6   : > { %606 = vmatprep.mubr.f32.mxu0 %v1656_v0  ;;  %v778_v0 = vld [vmem:[%s1944_s7 + $0x28] sm:$0xff] }
  0xf7   : > { %v1296_v9 = vpack.c.bf16 %v778_v0, %v777_v8 }
  0xf9   : > { %607 = vmatmul.mubr.f32.gmra.mrb[30].mxu0 %v407_v1  ;;  %1297 = vmatprep.subr.bf16.mxu1 %v1296_v9  ;;  %v448_v1 = vsub.s32 1, %v443_v26 }
  0xfa   : > { %1299 = vmatpush3.bf16.msra.mxu1 %v1296_v9 }
  0xfb   : > { %1301 = vmatprep.subr.bf16.mxu1 %v1300_v12  ;;  %v2076_v10 = vrot.slane %v440_v28, %v448_v1 }
  0xfe   : > { %1303 = vmatpush3.bf16.msra.mxu1 %v1300_v12 }
  0xff   : > { %1305 = vmatprep.subr.bf16.mxu1 %v1304_v15 }
 0x102   : > { %1307 = vmatpush3.bf16.msra.mxu1 %v1304_v15 }
 0x103   : > { %1309 = vmatprep.subr.bf16.mxu1 %v1308_v18 }
 0x106   : > { %1311 = vmatpush3.bf16.msra.mxu1 %v1308_v18 }
 0x107   : > { %1313 = vmatprep.subr.bf16.mxu1 %v1312_v21 }
 0x10a   : > { %1315 = vmatpush3.bf16.msra.mxu1 %v1312_v21 }
 0x10b   : > { %1317 = vmatprep.subr.bf16.mxu1 %v1316_v24 }
 0x10e   : > { %1319 = vmatpush3.bf16.msra.mxu1 %v1316_v24 }
 0x190   : > { %v518_v30 = vpop.f32.mrb[0].mxu0 }
 0x191   : > { %v519_v31 = vadd.f32 %v518_v30, %v2031_v29  ;;  %v520_v32 = vpop.f32.mrb[1].mxu0 }
 0x192   : > { %v521_v22 = vadd.f32 %v520_v32, %v2076_v10 }
 0x193   : > { %v613_v33 = vmul.f32 %v519_v31, %v519_v31 }
 0x194   : > { %v524_v34 = vpop.f32.mrb[2].mxu0 }
 0x195   : > { %v629_v35 = vmul.f32 %v613_v33, %v519_v31  ;;  %v2035_v36 = vadd.f32 %v524_v34, %v2031_v29  ;;  %v2037_v37 = vpop.f32.mrb[3].mxu0 }
 0x197   : > { %v645_v38 = vmul.f32 0.044715, %v629_v35  ;;  %v614_v39 = vmul.f32 %v2035_v36, %v2035_v36 }
 0x198   : > { %v530_v40 = vpop.f32.mrb[4].mxu0 }
 0x199   : > { %v630_v41 = vmul.f32 %v614_v39, %v2035_v36  ;;  %v2043_v42 = vadd.f32 %v530_v40, %v2031_v29  ;;  %v2045_v43 = vpop.f32.mrb[5].mxu0  ;;  %v661_v44 = vadd.f32 %v645_v38, %v519_v31 }
 0x19b   : > { %v646_v45 = vmul.f32 0.044715, %v630_v41  ;;  %v615_v46 = vmul.f32 %v2043_v42, %v2043_v42  ;;  %v677_v47 = vmul.f32 0.7978846, %v661_v44 }
 0x19c   : > { %v536_v48 = vpop.f32.mrb[6].mxu0 }
 0x19d   : > { %v662_v49 = vadd.f32 %v646_v45, %v2035_v36  ;;  %v631_v50 = vmul.f32 %v615_v46, %v2043_v42  ;;  %v2052_v51 = vadd.f32 %v536_v48, %v2031_v29  ;;  %v2054_v52 = vpop.f32.mrb[7].mxu0  ;;  %1404 = vtanh.f32 %v677_v47 }
 0x19f   : > { %v678_v53 = vmul.f32 0.7978846, %v662_v49  ;;  %v647_v54 = vmul.f32 0.044715, %v631_v50  ;;  %v616_v55 = vmul.f32 %v2052_v51, %v2052_v51 }
 0x1a0   : > { %v542_v56 = vpop.f32.mrb[8].mxu0 }
 0x1a1   : > { %1406 = vtanh.f32 %v678_v53  ;;  %v663_v57 = vadd.f32 %v647_v54, %v2043_v42  ;;  %v632_v58 = vmul.f32 %v616_v55, %v2052_v51  ;;  %v2061_v59 = vadd.f32 %v542_v56, %v2031_v29  ;;  %v2063_v60 = vpop.f32.mrb[9].mxu0 }
 0x1a2   : > { %v533_v55 = vadd.f32 %v2045_v43, %v2076_v10 }
 0x1a3   : > { %v679_v61 = vmul.f32 0.7978846, %v663_v57  ;;  %v648_v62 = vmul.f32 0.044715, %v632_v58  ;;  %v617_v63 = vmul.f32 %v2061_v59, %v2061_v59 }
 0x1a4   : > { %v548_v2 = vpop.f32.mrb[10].mxu0 }
 0x1a5   : > { %1408 = vtanh.f32 %v679_v61  ;;  %v664_v3 = vadd.f32 %v648_v62, %v2052_v51  ;;  %v633_v4 = vmul.f32 %v617_v63, %v2061_v59  ;;  %v2070_v5 = vadd.f32 %v548_v2, %v2031_v29  ;;  %v2072_v6 = vpop.f32.mrb[11].mxu0 }
 0x1a7   : > { %v1405_v7 = vpop.eup %1404  ;;  %v680_v8 = vmul.f32 0.7978846, %v664_v3  ;;  %v649_v0 = vmul.f32 0.044715, %v633_v4  ;;  %v618_v9 = vmul.f32 %v2070_v5, %v2070_v5 }
 0x1a8   : > { %v554_v11 = vpop.f32.mrb[12].mxu0  ;;  %v709_v12 = vadd.f32 1.0, %v1405_v7 }
 0x1a9   : > { %1410 = vtanh.f32 %v680_v8  ;;  %v665_v13 = vadd.f32 %v649_v0, %v2061_v59  ;;  %v634_v14 = vmul.f32 %v618_v9, %v2070_v5  ;;  %v2081_v15 = vadd.f32 %v554_v11, %v2031_v29  ;;  %v2083_v16 = vpop.f32.mrb[13].mxu0 }
 0x1aa   : > { %v725_v17 = vmul.f32 0.5, %v709_v12  ;;  %v539_v8 = vadd.f32 %v2054_v52, %v2076_v10 }
 0x1ab   : > { %v1407_v18 = vpop.eup %1406  ;;  %v681_v19 = vmul.f32 0.7978846, %v665_v13  ;;  %v650_v20 = vmul.f32 0.044715, %v634_v14  ;;  %v619_v21 = vmul.f32 %v2081_v15, %v2081_v15 }
 0x1ac   : > { %v710_v23 = vadd.f32 1.0, %v1407_v18  ;;  %v560_v24 = vpop.f32.mrb[14].mxu0  ;;  %v741_v25 = vmul.f32 %v725_v17, %v519_v31  ;;  %v527_v31 = vadd.f32 %v2037_v37, %v2076_v10 }
 0x1ad   : > { %1412 = vtanh.f32 %v681_v19  ;;  %v666_v26 = vadd.f32 %v650_v20, %v2070_v5  ;;  %v635_v27 = vmul.f32 %v619_v21, %v2081_v15  ;;  %v2091_v28 = vadd.f32 %v560_v24, %v2031_v29  ;;  %v2093_v30 = vpop.f32.mrb[15].mxu0 }
 0x1ae   : > { %v726_v33 = vmul.f32 0.5, %v710_v23  ;;  %v757_v34 = vmul.f32 %v741_v25, %v521_v22  ;;  %v545_v22 = vadd.f32 %v2063_v60, %v2076_v10 }
 0x1af   : > { %v1409_v35 = vpop.eup %1408  ;;  %v682_v38 = vmul.f32 0.7978846, %v666_v26  ;;  %v651_v39 = vmul.f32 0.044715, %v635_v27  ;;  %v620_v32 = vmul.f32 %v2091_v28, %v2091_v28 }
 0x1b0   : > { %v742_v40 = vmul.f32 %v726_v33, %v2035_v36  ;;  %v711_v41 = vadd.f32 1.0, %v1409_v35  ;;  %v566_v44 = vpop.f32.mrb[16].mxu0  ;;  %1232 = vmatprep.mubr.f32.mxu1 %v757_v34 }
 0x1b1   : > { %1414 = vtanh.f32 %v682_v38  ;;  %v667_v45 = vadd.f32 %v651_v39, %v2081_v15  ;;  %v636_v46 = vmul.f32 %v620_v32, %v2091_v28  ;;  %v2103_v47 = vadd.f32 %v566_v44, %v2031_v29  ;;  %v2105_v48 = vpop.f32.mrb[17].mxu0 }
 0x1b2   : > { %v758_v49 = vmul.f32 %v742_v40, %v527_v31  ;;  %v727_v50 = vmul.f32 0.5, %v711_v41  ;;  %v551_v31 = vadd.f32 %v2072_v6, %v2076_v10 }
 0x1b3   : > { %v1411_v53 = vpop.eup %1410  ;;  %v683_v54 = vmul.f32 0.7978846, %v667_v45  ;;  %v652_v37 = vmul.f32 0.044715, %v636_v46  ;;  %v621_v36 = vmul.f32 %v2103_v47, %v2103_v47 }
 0x1b4   : > { %v743_v56 = vmul.f32 %v727_v50, %v2043_v42  ;;  %v712_v57 = vadd.f32 1.0, %v1411_v53  ;;  %v572_v58 = vpop.f32.mrb[18].mxu0  ;;  %1233 = vmatmul.mubr.f32.vlgmr.msra.gmra.mrb[0].mxu1 %v758_v49 }
 0x1b5   : > { %1416 = vtanh.f32 %v683_v54  ;;  %v668_v61 = vadd.f32 %v652_v37, %v2091_v28  ;;  %v637_v62 = vmul.f32 %v621_v36, %v2103_v47  ;;  %v2115_v63 = vadd.f32 %v572_v58, %v2031_v29  ;;  %v2117_v1 = vpop.f32.mrb[19].mxu0 }
 0x1b6   : > { %v759_v2 = vmul.f32 %v743_v56, %v533_v55  ;;  %v728_v3 = vmul.f32 0.5, %v712_v57  ;;  %v557_v55 = vadd.f32 %v2083_v16, %v2076_v10 }
 0x1b7   : > { %v1413_v4 = vpop.eup %1412  ;;  %v684_v7 = vmul.f32 0.7978846, %v668_v61  ;;  %v653_v43 = vmul.f32 0.044715, %v637_v62  ;;  %v622_v42 = vmul.f32 %v2115_v63, %v2115_v63 }
 0x1b8   : > { %v744_v0 = vmul.f32 %v728_v3, %v2052_v51  ;;  %v713_v9 = vadd.f32 1.0, %v1413_v4  ;;  %v578_v11 = vpop.f32.mrb[20].mxu0  ;;  %1235 = vmatprep.mubr.f32.mxu1 %v759_v2 }
 0x1b9   : > { %1418 = vtanh.f32 %v684_v7  ;;  %v669_v12 = vadd.f32 %v653_v43, %v2103_v47  ;;  %v638_v13 = vmul.f32 %v622_v42, %v2115_v63  ;;  %v2127_v14 = vadd.f32 %v578_v11, %v2031_v29  ;;  %v2129_v17 = vpop.f32.mrb[21].mxu0 }
 0x1ba   : > { %v760_v18 = vmul.f32 %v744_v0, %v539_v8  ;;  %v729_v19 = vmul.f32 0.5, %v713_v9  ;;  %v563_v8 = vadd.f32 %v2093_v30, %v2076_v10 }
 0x1bb   : > { %v1415_v20 = vpop.eup %1414  ;;  %v685_v21 = vmul.f32 0.7978846, %v669_v12  ;;  %v654_v52 = vmul.f32 0.044715, %v638_v13  ;;  %v623_v51 = vmul.f32 %v2127_v14, %v2127_v14 }
 0x1bc   : > { %v745_v23 = vmul.f32 %v729_v19, %v2061_v59  ;;  %v714_v24 = vadd.f32 1.0, %v1415_v20  ;;  %v584_v25 = vpop.f32.mrb[22].mxu0  ;;  %1236 = vmatmul.mubr.f32.gmra.mrb[2].mxu1 %v760_v18 }
 0x1bd   : > { %1420 = vtanh.f32 %v685_v21  ;;  %v670_v26 = vadd.f32 %v654_v52, %v2115_v63  ;;  %v639_v27 = vmul.f32 %v623_v51, %v2127_v14  ;;  %v2139_v33 = vadd.f32 %v584_v25, %v2031_v29  ;;  %v2141_v34 = vpop.f32.mrb[23].mxu0 }
 0x1be   : > { %v761_v35 = vmul.f32 %v745_v23, %v545_v22  ;;  %v730_v38 = vmul.f32 0.5, %v714_v24  ;;  %v569_v22 = vadd.f32 %v2105_v48, %v2076_v10 }
 0x1bf   : > { %v1417_v39 = vpop.eup %1416  ;;  %v686_v32 = vmul.f32 0.7978846, %v670_v26  ;;  %v655_v60 = vmul.f32 0.044715, %v639_v27  ;;  %v624_v59 = vmul.f32 %v2139_v33, %v2139_v33 }
 0x1c0   : > { %v746_v40 = vmul.f32 %v730_v38, %v2070_v5  ;;  %v715_v41 = vadd.f32 1.0, %v1417_v39  ;;  %v590_v44 = vpop.f32.mrb[24].mxu0  ;;  %1238 = vmatprep.mubr.f32.mxu1 %v761_v35 }
 0x1c1   : > { %1422 = vtanh.f32 %v686_v32  ;;  %v671_v45 = vadd.f32 %v655_v60, %v2127_v14  ;;  %v640_v46 = vmul.f32 %v624_v59, %v2139_v33  ;;  %v2151_v49 = vadd.f32 %v590_v44, %v2031_v29  ;;  %v2153_v50 = vpop.f32.mrb[25].mxu0 }
 0x1c2   : > { %v762_v53 = vmul.f32 %v746_v40, %v551_v31  ;;  %v731_v54 = vmul.f32 0.5, %v715_v41 }
 0x1c3   : > { %v1419_v37 = vpop.eup %1418  ;;  %v687_v36 = vmul.f32 0.7978846, %v671_v45  ;;  %v656_v6 = vmul.f32 0.044715, %v640_v46  ;;  %v625_v5 = vmul.f32 %v2151_v49, %v2151_v49 }
 0x1c4   : > { %v747_v56 = vmul.f32 %v731_v54, %v2081_v15  ;;  %v716_v57 = vadd.f32 1.0, %v1419_v37  ;;  %v596_v58 = vpop.f32.mrb[26].mxu0  ;;  %1239 = vmatmul.mubr.f32.gmra.mrb[4].mxu1 %v762_v53 }
 0x1c5   : > { %1424 = vtanh.f32 %v687_v36  ;;  %v672_v61 = vadd.f32 %v656_v6, %v2139_v33  ;;  %v641_v62 = vmul.f32 %v625_v5, %v2151_v49  ;;  %v2163_v2 = vadd.f32 %v596_v58, %v2031_v29  ;;  %v2165_v3 = vpop.f32.mrb[27].mxu0 }
 0x1c6   : > { %v763_v4 = vmul.f32 %v747_v56, %v557_v55  ;;  %v732_v7 = vmul.f32 0.5, %v716_v57  ;;  %v581_v36 = vadd.f32 %v2129_v17, %v2076_v10  ;;  %v587_v58 = vadd.f32 %v2141_v34, %v2076_v10 }
 0x1c7   : > { %v1421_v43 = vpop.eup %1420  ;;  %v688_v42 = vmul.f32 0.7978846, %v672_v61  ;;  %v657_v16 = vmul.f32 0.044715, %v641_v62  ;;  %v626_v15 = vmul.f32 %v2163_v2, %v2163_v2  ;;  %v599_v34 = vadd.f32 %v2165_v3, %v2076_v10 }
 0x1c8   : > { %v748_v0 = vmul.f32 %v732_v7, %v2091_v28  ;;  %v717_v9 = vadd.f32 1.0, %v1421_v43  ;;  %v602_v11 = vpop.f32.mrb[28].mxu0  ;;  %1241 = vmatprep.mubr.f32.mxu1 %v763_v4 }
 0x1c9   : > { %1426 = vtanh.f32 %v688_v42  ;;  %v673_v12 = vadd.f32 %v657_v16, %v2151_v49  ;;  %v642_v13 = vmul.f32 %v626_v15, %v2163_v2  ;;  %v2175_v18 = vadd.f32 %v602_v11, %v2031_v29  ;;  %v2177_v19 = vpop.f32.mrb[29].mxu0 }
 0x1ca   : > { %v764_v20 = vmul.f32 %v748_v0, %v563_v8  ;;  %v733_v21 = vmul.f32 0.5, %v717_v9 }
 0x1cb   : > { %v1423_v52 = vpop.eup %1422  ;;  %v689_v51 = vmul.f32 0.7978846, %v673_v12  ;;  %v658_v30 = vmul.f32 0.044715, %v642_v13  ;;  %v627_v28 = vmul.f32 %v2175_v18, %v2175_v18 }
 0x1cc   : > { %v749_v23 = vmul.f32 %v733_v21, %v2103_v47  ;;  %v718_v24 = vadd.f32 1.0, %v1423_v52  ;;  %v608_v25 = vpop.f32.mrb[30].mxu0  ;;  %1242 = vmatmul.mubr.f32.gmra.mrb[6].mxu1 %v764_v20  ;;  %v575_v47 = vadd.f32 %v2117_v1, %v2076_v10 }
 0x1cd   : > { %1428 = vtanh.f32 %v689_v51  ;;  %v674_v26 = vadd.f32 %v658_v30, %v2163_v2  ;;  %v643_v27 = vmul.f32 %v627_v28, %v2175_v18  ;;  %v609_v35 = vadd.f32 %v608_v25, %v2031_v29  ;;  %v610_v38 = vpop.f32.mrb[31].mxu0 }
 0x1ce   : > { %v765_v39 = vmul.f32 %v749_v23, %v569_v22  ;;  %v734_v32 = vmul.f32 0.5, %v718_v24  ;;  %v611_v3 = vadd.f32 %v610_v38, %v2076_v10 }
 0x1cf   : > { %v1425_v60 = vpop.eup %1424  ;;  %v690_v59 = vmul.f32 0.7978846, %v674_v26  ;;  %v659_v31 = vmul.f32 0.044715, %v643_v27  ;;  %v628_v40 = vmul.f32 %v609_v35, %v609_v35 }
 0x1d0   : > { %v750_v48 = vmul.f32 %v734_v32, %v2115_v63  ;;  %v719_v41 = vadd.f32 1.0, %v1425_v60  ;;  %1244 = vmatprep.mubr.f32.mxu1 %v765_v39 }
 0x1d1   : > { %1430 = vtanh.f32 %v690_v59  ;;  %v675_v44 = vadd.f32 %v659_v31, %v2175_v18  ;;  %v644_v45 = vmul.f32 %v628_v40, %v609_v35 }
 0x1d2   : > { %v766_v46 = vmul.f32 %v750_v48, %v575_v47  ;;  %v735_v29 = vmul.f32 0.5, %v719_v41 }
 0x1d3   : > { %v1427_v53 = vpop.eup %1426  ;;  %v691_v54 = vmul.f32 0.7978846, %v675_v44  ;;  %v660_v37 = vmul.f32 0.044715, %v644_v45 }
 0x1d4   : > { %v751_v6 = vmul.f32 %v735_v29, %v2127_v14  ;;  %v720_v5 = vadd.f32 1.0, %v1427_v53  ;;  %1245 = vmatmul.mubr.f32.gmra.mrb[8].mxu1 %v766_v46  ;;  %v593_v14 = vadd.f32 %v2153_v50, %v2076_v10 }
 0x1d5   : > { %1432 = vtanh.f32 %v691_v54  ;;  %v676_v63 = vadd.f32 %v660_v37, %v609_v35 }
 0x1d6   : > { %v767_v1 = vmul.f32 %v751_v6, %v581_v36  ;;  %v736_v55 = vmul.f32 0.5, %v720_v5 }
 0x1d7   : > { %v1429_v56 = vpop.eup %1428  ;;  %v692_v57 = vmul.f32 0.7978846, %v676_v63 }
 0x1d8   : > { %v752_v61 = vmul.f32 %v736_v55, %v2139_v33  ;;  %v721_v62 = vadd.f32 1.0, %v1429_v56  ;;  %1247 = vmatprep.mubr.f32.mxu1 %v767_v1 }
 0x1d9   : > { %1434 = vtanh.f32 %v692_v57 }
 0x1da   : > { %v768_v4 = vmul.f32 %v752_v61, %v587_v58  ;;  %v737_v17 = vmul.f32 0.5, %v721_v62 }
 0x1db   : > { %v1431_v7 = vpop.eup %1430 }
 0x1dc   : > { %v753_v43 = vmul.f32 %v737_v17, %v2151_v49  ;;  %v722_v42 = vadd.f32 1.0, %v1431_v7  ;;  %1248 = vmatmul.mubr.f32.gmra.mrb[10].mxu1 %v768_v4  ;;  %v605_v49 = vadd.f32 %v2177_v19, %v2076_v10  ;;  %v1157_v19 = vld [vmem:[%s390_s11] ss:$0 sm:$0xff] }
 0x1de   : > { %v769_v16 = vmul.f32 %v753_v43, %v593_v14  ;;  %v738_v15 = vmul.f32 0.5, %v722_v42 }
 0x1df   : > { %v1433_v8 = vpop.eup %1432 }
 0x1e0   : > { %v754_v33 = vmul.f32 %v738_v15, %v2163_v2  ;;  %v723_v0 = vadd.f32 1.0, %v1433_v8  ;;  %1250 = vmatprep.mubr.f32.mxu1 %v769_v16 }
 0x1e2   : > { %v770_v9 = vmul.f32 %v754_v33, %v599_v34  ;;  %v739_v11 = vmul.f32 0.5, %v723_v0 }
 0x1e3   : > { %v1435_v12 = vpop.eup %1434 }
 0x1e4   : > { %v755_v50 = vmul.f32 %v739_v11, %v2175_v18  ;;  %v724_v13 = vadd.f32 1.0, %v1435_v12  ;;  %1251 = vmatmul.mubr.f32.gmra.mrb[12].mxu1 %v770_v9 }
 0x1e6   : > { %v771_v20 = vmul.f32 %v755_v50, %v605_v49  ;;  %v740_v21 = vmul.f32 0.5, %v724_v13 }
 0x1e8   : > { %v756_v2 = vmul.f32 %v740_v21, %v609_v35  ;;  %1253 = vmatprep.mubr.f32.mxu1 %v771_v20 }
 0x1ea   : > { %v772_v52 = vmul.f32 %v756_v2, %v611_v3 }
 0x1ec   : > { %1254 = vmatmul.mubr.f32.gmra.mrb[14].mxu1 %v772_v52 }
 0x287   : > { %v1234_v51 = vpop.f32.mrb[0].mxu1 }
 0x288   : > { %v868_v18 = vadd.f32 %v1234_v51, %v1157_v19  ;;  %v862_v30 = vpop.f32.mrb[1].mxu1 }
 0x289   : > { %v863_v28 = vadd.f32 %v1157_v19, %v862_v30 }
 0x28a   : > { %942 = vst [vmem:[%s2213_s1 + $0x8] sm:$0xff] %v868_v18 }
 0x28b   : > { %941 = vst [vmem:[%s2213_s1] sm:$0xff] %v863_v28 }
 0x28f   : > { %v1237_v10 = vpop.f32.mrb[2].mxu1 }
 0x290   : > { %v878_v22 = vadd.f32 %v1237_v10, %v1157_v19  ;;  %v872_v23 = vpop.f32.mrb[3].mxu1 }
 0x291   : > { %v873_v24 = vadd.f32 %v1157_v19, %v872_v23 }
 0x292   : > { %944 = vst [vmem:[%s2213_s1 + $0x18] sm:$0xff] %v878_v22 }
 0x293   : > { %943 = vst [vmem:[%s2213_s1 + $0x10] sm:$0xff] %v873_v24 }
 0x297   : > { %v1240_v25 = vpop.f32.mrb[4].mxu1 }
 0x298   : > { %v888_v26 = vadd.f32 %v1240_v25, %v1157_v19  ;;  %v882_v27 = vpop.f32.mrb[5].mxu1 }
 0x299   : > { %v883_v35 = vadd.f32 %v1157_v19, %v882_v27 }
 0x29a   : > { %946 = vst [vmem:[%s2213_s1 + $0x28] sm:$0xff] %v888_v26 }
 0x29b   : > { %945 = vst [vmem:[%s2213_s1 + $0x20] sm:$0xff] %v883_v35 }
 0x29f   : > { %v1243_v38 = vpop.f32.mrb[6].mxu1 }
 0x2a0   : > { %v898_v39 = vadd.f32 %v1243_v38, %v1157_v19  ;;  %v892_v32 = vpop.f32.mrb[7].mxu1 }
 0x2a1   : > { %v893_v60 = vadd.f32 %v1157_v19, %v892_v32 }
 0x2a2   : > { %948 = vst [vmem:[%s2213_s1 + $0x38] sm:$0xff] %v898_v39 }
 0x2a3   : > { %947 = vst [vmem:[%s2213_s1 + $0x30] sm:$0xff] %v893_v60 }
 0x2a7   : > { %v1246_v59 = vpop.f32.mrb[8].mxu1 }
 0x2a8   : > { %v908_v31 = vadd.f32 %v1246_v59, %v1157_v19  ;;  %v902_v40 = vpop.f32.mrb[9].mxu1 }
 0x2a9   : > { %v903_v47 = vadd.f32 %v1157_v19, %v902_v40 }
 0x2aa   : > { %950 = vst [vmem:[%s2213_s1 + $0x48] sm:$0xff] %v908_v31 }
 0x2ab   : > { %949 = vst [vmem:[%s2213_s1 + $0x40] sm:$0xff] %v903_v47 }
 0x2af   : > { %v1249_v48 = vpop.f32.mrb[10].mxu1 }
 0x2b0   : > { %v918_v41 = vadd.f32 %v1249_v48, %v1157_v19  ;;  %v912_v44 = vpop.f32.mrb[11].mxu1 }
 0x2b1   : > { %v913_v45 = vadd.f32 %v1157_v19, %v912_v44 }
 0x2b2   : > { %952 = vst [vmem:[%s2213_s1 + $0x58] sm:$0xff] %v918_v41 }
 0x2b3   : > { %951 = vst [vmem:[%s2213_s1 + $0x50] sm:$0xff] %v913_v45 }
 0x2b7   : > { %v1252_v46 = vpop.f32.mrb[12].mxu1 }
 0x2b8   : > { %v928_v29 = vadd.f32 %v1252_v46, %v1157_v19  ;;  %v922_v53 = vpop.f32.mrb[13].mxu1 }
 0x2b9   : > { %v923_v54 = vadd.f32 %v1157_v19, %v922_v53 }
 0x2ba   : > { %954 = vst [vmem:[%s2213_s1 + $0x68] sm:$0xff] %v928_v29 }
 0x2bb   : > { %953 = vst [vmem:[%s2213_s1 + $0x60] sm:$0xff] %v923_v54 }
 0x2bf   : > { %v1255_v37 = vpop.f32.mrb[14].mxu1 }
 0x2c0   : > { %v938_v36 = vadd.f32 %v1255_v37, %v1157_v19  ;;  %v932_v6 = vpop.f32.mrb[15].mxu1 }
 0x2c1   : > { %v933_v5 = vadd.f32 %v1157_v19, %v932_v6 }
 0x2c2   : > { %956 = vst [vmem:[%s2213_s1 + $0x78] sm:$0xff] %v938_v36 }
 0x2c3   : > { %955 = vst [vmem:[%s2213_s1 + $0x70] sm:$0xff] %v933_v5 }
 0x2c4   : > { %1569 = shalt.err (!%p1566_p13)
}
 0x2c5   : > { %s1570_s25 = scalar_lea.hbm %s2234_s12, 2048  ;;  %s1574_s13 = scalar_lea.hbm %s2291_s5, 8192 }
 0x2c6   : > { %p1571_p0 = scmp.ne.s32.totalorder %s2234_s12, %s1570_s25  ;;  %p1575_p1 = scmp.lt.u32.totalorder %s2234_s12, %s2291_s5 }
 0x2c7   : > { %p1576_p5 = scmp.lt.u32.totalorder %s1574_s13, %s1570_s25  ;;  %p1578_p11 = scmp.lt.u32.totalorder %s1570_s25, %s2234_s12 }
 0x2c8   : > { %p1572_p3 = pnand %p1571_p0, %p2321_p6 }
 0x2c9   : > { %p1577_p4 = por %p1576_p5, %p1575_p1 }
 0x2ca   : > { %p1573_p8 = pneg %p1572_p3 }
 0x2cb   : > { %p1579_p10 = por %p1578_p11, %p1577_p4 }
 0x2cd   : > { %p1580_p12 = pnand %p1579_p10, %p1573_p8 }
 0x2cf   : > { %1583 = shalt.err (!%p1580_p12)
}
 0x2d0   : > { %s1658_s30 = smov 128   ;;  %s1659_s20 = smov 8  }
 0x2d1   : > { %1328 = dma.vmem_to_hbm [thread:$0]  (%p2321_p6), %s2236_s26, 2048, %s2234_s12, %s958_s27, %s1658_s30, %s1658_s30, %s1659_s20  }
 0x2d2 PF: > { %p1348_p9 = scmp.ge.s32.totalorder %s1646_s23, 2  ;;  %s988_s11 = sand.u32 1, %s1626_s18  }
 0x2d3   : > { %p2322_p7 = scmp.ne.s32.totalorder %s2309_s8, 0  ;;  %s989_s1 = scalar_lea.sflag [#allocation4], %s988_s11 }
 0x2d5   : > { %p1344_p2 = pnand %p1348_p9, %p2322_p7 }
 0x2d7   : > { %1621 = dma.done.wait (!%p1344_p2), %s989_s1, 2048  }
 0x2d8   : > { %1623 = vsyncadd (!%p1344_p2), %s989_s1, 4294965248  ;;  %s27_s23 = sadd.s32 1, %s1646_s23   ;;  %s2323_s28 = sld [smem:[#allocation15_spill]] }
 0x2d9   : > { %p24_p13 = scmp.ge.s32.totalorder %s27_s23, 6   ;;  %s2324_s20 = sld [smem:[#allocation17_spill]] }
 0x2da   : > { %s2325_s6 = sld [smem:[#allocation16_spill]]  ;;  %s2326_s18 = smov %s1630_s19 }
 0x2db   : > { %s2328_s21 = smov %s1642_s22  ;;  %26 = sbr.rel (!%p24_p13) target bundleno = 13 (0xd), region = 125 }
 0x2de   : > { %s2327_s19 = smov %s2323_s28 }
 0x2e0   : > { %s2329_s22 = smov %s2325_s6 }
 0x2e2   :  { %994 = vsyncpa [#allocation3], 1 }
 0x2e3   :  { %996 = vsyncpa [#allocation3 + $0x1], 1 }
 0x2e4   :  { %997 = vsyncpa [#allocation6], 1 }
 0x2e5   :  { %999 = vsyncpa [#allocation6 + $0x1], 1 }
 0x2e6   :  { %1000 = vsyncpa [#allocation9], 1 }
 0x2e7   :  { %1002 = vsyncpa [#allocation9 + $0x1], 1 }
 0x2e8   :  { %1003 = vsyncpa [#allocation4], 1 }
 0x2e9   :  { %1005 = vsyncpa [#allocation4 + $0x1], 1 }

</bundles_post_ra>
